<compile_context>
chip_gen: v7x
topology: tpu7x:2x2x1
jax: 0.10.0
libtpu: 0.0.40
codegen_flags: <defaults>
</compile_context>

<pallas_src>
import functools

import jax
import jax.numpy as jnp
from jax.experimental import pallas as pl
from jax.experimental.pallas import tpu as pltpu

IN_FEATURES = 28 * 28  # 784, fixed by the module


def _round_up(x, m):
    return (x + m - 1) // m * m


def _mlp_kernel(x_ref, w1_ref, b1_ref, w2_ref, b2_ref, w3_ref, b3_ref, o_ref):
    """Fused 3-layer MLP on one batch tile: relu(relu(x@W1+b1)@W2+b2)@W3+b3.

    x/W* are bf16 (MXU-native), accumulation is f32, bias-add/ReLU are f32,
    intermediates are re-cast to bf16 only to feed the next matmul, and the
    logits are written back as bf16. Weights/biases use a constant index_map
    with Buffered(1) so they stay VMEM-resident (single copy) across the grid.
    """
    x = x_ref[...]                                                   # bf16 (TB, 784)
    h1 = jnp.dot(x, w1_ref[...], preferred_element_type=jnp.float32) + b1_ref[...]
    h1 = jnp.maximum(h1, 0.0).astype(jnp.bfloat16)
    h2 = jnp.dot(h1, w2_ref[...], preferred_element_type=jnp.float32) + b2_ref[...]
    h2 = jnp.maximum(h2, 0.0).astype(jnp.bfloat16)
    out = jnp.dot(h2, w3_ref[...], preferred_element_type=jnp.float32) + b3_ref[...]
    o_ref[...] = out.astype(o_ref.dtype)                             # bf16 writeback


def prepare_params(w1, b1, w2, b2, w3, b3):
    """One-time lane-padding (to 128 multiples) + bf16 cast of the weights.

    Hoisted out of the per-call forward so the weight pad/convert HBM traffic
    is paid once, not on every inference call. Weights are (in, out); biases
    (1, out). The contraction dim of x / rows of W1 stay at 784 (unpadded).
    Returns (padded_params, out_features).
    """
    k, h1 = w1.shape
    h2 = w2.shape[1]
    out_f = w3.shape[1]
    h1p, h2p, outp = (_round_up(d, 128) for d in (h1, h2, out_f))

    w1b = jnp.zeros((k, h1p), jnp.bfloat16).at[:, :h1].set(w1.astype(jnp.bfloat16))
    w2b = jnp.zeros((h1p, h2p), jnp.bfloat16).at[:h1, :h2].set(w2.astype(jnp.bfloat16))
    w3b = jnp.zeros((h2p, outp), jnp.bfloat16).at[:h2, :out_f].set(w3.astype(jnp.bfloat16))
    b1p = jnp.zeros((1, h1p), jnp.float32).at[:, :h1].set(b1.astype(jnp.float32).reshape(1, -1))
    b2p = jnp.zeros((1, h2p), jnp.float32).at[:, :h2].set(b2.astype(jnp.float32).reshape(1, -1))
    b3p = jnp.zeros((1, outp), jnp.float32).at[:, :out_f].set(b3.astype(jnp.float32).reshape(1, -1))
    return (w1b, b1p, w2b, b2p, w3b, b3p), out_f


@functools.partial(jax.jit, static_argnames=("out_features", "tb_max"))
def simple_nn_forward(img, params, *, out_features=10, tb_max=512):
    """JAX wrapper mirroring SimpleNN.forward.

    img: (B, 1, 28, 28) float32 (NCHW, like the PyTorch module).
    params: output of prepare_params (pre-padded bf16 weights, f32 biases).
    Returns logits of shape (B, out_features) in float32.
    """
    w1b, b1p, w2b, b2p, w3b, b3p = params
    k = w1b.shape[0]            # 784 — unpadded contraction dim (full-dim block)
    h1p = w1b.shape[1]
    h2p = w2b.shape[1]
    outp = w3b.shape[1]

    # Glue: img.view(-1, 28*28) + bf16 cast of activations.
    x = img.reshape(-1, k).astype(jnp.bfloat16)
    batch = x.shape[0]

    # Batch tile: multiple of 16 (bf16 packs 16 rows per sublane group), and
    # rounding here also keeps any tb_max legal w.r.t. the (8,128) rule.
    tb = _round_up(min(tb_max, batch), 16)
    # If a big batch would fit in a single grid step, split it so the
    # "parallel" grid axis can actually engage v7x's second TensorCore.
    if batch > 32 and _round_up(batch, tb) == tb:
        tb = _round_up((batch + 1) // 2, 16)
    bp = _round_up(batch, tb)

    if bp != batch:
        x = jnp.zeros((bp, k), jnp.bfloat16).at[:batch].set(x)

    # Weights/biases: same block every step -> VMEM-resident, single-buffered.
    resident = lambda a: pl.BlockSpec(a.shape, lambda i: (0, 0),
                                      pipeline_mode=pl.Buffered(1))

    flops = 2 * bp * (k * h1p + h1p * h2p + h2p * outp)
    bytes_accessed = (bp * k * 2                                   # x (bf16)
                      + (w1b.size + w2b.size + w3b.size) * 2       # weights (bf16)
                      + (b1p.size + b2p.size + b3p.size) * 4       # biases (f32)
                      + bp * outp * 2)                             # logits (bf16)

    out = pl.pallas_call(
        _mlp_kernel,
        out_shape=jax.ShapeDtypeStruct((bp, outp), jnp.bfloat16),
        grid=(bp // tb,),
        in_specs=[
            pl.BlockSpec((tb, k), lambda i: (i, 0)),   # x: streamed over batch
            resident(w1b), resident(b1p),
            resident(w2b), resident(b2p),
            resident(w3b), resident(b3p),
        ],
        out_specs=pl.BlockSpec((tb, outp), lambda i: (i, 0)),
        compiler_params=pltpu.CompilerParams(
            dimension_semantics=("parallel",),          # both TCs on v7x
        ),
        cost_estimate=pl.CostEstimate(
            flops=flops, transcendentals=0, bytes_accessed=bytes_accessed),
    )(x, w1b, b1p, w2b, b2p, w3b, b3p)

    # Strip batch padding / padded output columns, upcast bf16 logits to f32.
    return out[:batch, :out_features].astype(jnp.float32)


def init_params(key, hidden_size_1=128, hidden_size_2=256, out_features=10):
    """Deterministic init mimicking nn.Linear (uniform +/-1/sqrt(fan_in)).

    Weights are stored transposed vs. PyTorch: (in_features, out_features).
    """
    def linear(k_, fan_in, fan_out):
        kw, kb = jax.random.split(k_)
        bound = 1.0 / jnp.sqrt(fan_in)
        w = jax.random.uniform(kw, (fan_in, fan_out), jnp.float32, -bound, bound)
        b = jax.random.uniform(kb, (1, fan_out), jnp.float32, -bound, bound)
        return w, b

    k1, k2, k3 = jax.random.split(key, 3)
    w1, b1 = linear(k1, IN_FEATURES, hidden_size_1)
    w2, b2 = linear(k2, hidden_size_1, hidden_size_2)
    w3, b3 = linear(k3, hidden_size_2, out_features)
    return w1, b1, w2, b2, w3, b3


def _reference(img, w1, b1, w2, b2, w3, b3):
    """Pure-JAX reference applying the same bf16-compute / f32-accumulate math
    (including the bf16 logit writeback the kernel performs)."""
    x = img.reshape(-1, IN_FEATURES).astype(jnp.bfloat16)
    h1 = jnp.maximum(
        jnp.dot(x, w1.astype(jnp.bfloat16), preferred_element_type=jnp.float32)
        + b1.reshape(1, -1), 0.0)
    h2 = jnp.maximum(
        jnp.dot(h1.astype(jnp.bfloat16), w2.astype(jnp.bfloat16),
                preferred_element_type=jnp.float32) + b2.reshape(1, -1), 0.0)
    out = jnp.dot(h2.astype(jnp.bfloat16), w3.astype(jnp.bfloat16),
                  preferred_element_type=jnp.float32) + b3.reshape(1, -1)
    return out.astype(jnp.bfloat16).astype(jnp.float32)


if __name__ == "__main__":
    key = jax.random.PRNGKey(0)
    k_img, k_img2, k_img3, k_params = jax.random.split(key, 4)

    # Small-but-consistent shapes: NCHW image (B, 1, 28, 28); hidden sizes
    # shrunk from the PyTorch defaults (1000, 2000) to (128, 256) so the
    # self-test stays tiny (the kernel handles the defaults unchanged).
    raw_params = init_params(k_params, hidden_size_1=128, hidden_size_2=256)
    params, out_f = prepare_params(*raw_params)   # one-time pad + bf16 cast

    # Check 1: tiny batch (single grid step).
    img = jax.random.normal(k_img, (2, 1, 28, 28), jnp.float32)
    logits = simple_nn_forward(img, params, out_features=out_f)
    jax.block_until_ready(logits)
    ref = _reference(img, *raw_params)
    assert logits.shape == (2, 10)
    assert jnp.allclose(logits, ref, atol=2e-3, rtol=2e-3)

    # Check 2: ragged batch with a tiny tb_max (rounded up to 16) so the batch
    # grid and tail padding are exercised: B=18, tb=16 -> grid=(2,).
    img2 = jax.random.normal(k_img2, (18, 1, 28, 28), jnp.float32)
    logits2 = simple_nn_forward(img2, params, out_features=out_f, tb_max=8)
    jax.block_until_ready(logits2)
    ref2 = _reference(img2, *raw_params)
    assert logits2.shape == (18, 10)
    assert jnp.allclose(logits2, ref2, atol=2e-3, rtol=2e-3)

    # Check 3: a batch that would fit one tile gets auto-split into 2 grid
    # steps (the v7x megacore path): B=100 -> tb=64, grid=(2,).
    img3 = jax.random.normal(k_img3, (100, 1, 28, 28), jnp.float32)
    logits3 = simple_nn_forward(img3, params, out_features=out_f)
    jax.block_until_ready(logits3)
    ref3 = _reference(img3, *raw_params)
    assert logits3.shape == (100, 10)
    assert jnp.allclose(logits3, ref3, atol=2e-3, rtol=2e-3)

    print("KERNEL_OK")
</pallas_src>

<mosaic_0001>
module attributes {stable_mosaic.version = 11 : i64} {
  func.func @_mlp_kernel(%arg0: i32, %arg1: memref<16x784xbf16, #tpu.memory_space<vmem>>, %arg2: memref<784x128xbf16, #tpu.memory_space<vmem>>, %arg3: memref<1x128xf32, #tpu.memory_space<vmem>>, %arg4: memref<128x256xbf16, #tpu.memory_space<vmem>>, %arg5: memref<1x256xf32, #tpu.memory_space<vmem>>, %arg6: memref<256x128xbf16, #tpu.memory_space<vmem>>, %arg7: memref<1x128xf32, #tpu.memory_space<vmem>>, %arg8: memref<16x128xbf16, #tpu.memory_space<vmem>>) attributes {dimension_semantics = [#tpu.dimension_semantics<parallel>], iteration_bounds = array<i64: 1>, scalar_prefetch = 0 : i64, scratch_operands = 0 : i64, tpu.core_type = #tpu.core_type<tc>, window_params = [{transform_indices = @transform_0, window_bounds = array<i64: 16, 784>}, {pipeline_mode = #tpu.pipeline_mode<synchronous>, transform_indices = @transform_1, window_bounds = array<i64: 784, 128>}, {pipeline_mode = #tpu.pipeline_mode<synchronous>, transform_indices = @transform_2, window_bounds = array<i64: 1, 128>}, {pipeline_mode = #tpu.pipeline_mode<synchronous>, transform_indices = @transform_3, window_bounds = array<i64: 128, 256>}, {pipeline_mode = #tpu.pipeline_mode<synchronous>, transform_indices = @transform_4, window_bounds = array<i64: 1, 256>}, {pipeline_mode = #tpu.pipeline_mode<synchronous>, transform_indices = @transform_5, window_bounds = array<i64: 256, 128>}, {pipeline_mode = #tpu.pipeline_mode<synchronous>, transform_indices = @transform_6, window_bounds = array<i64: 1, 128>}, {transform_indices = @transform_7, window_bounds = array<i64: 16, 128>}]} {
    %c0 = arith.constant 0 : index
    %c0_0 = arith.constant 0 : index
    %0 = vector.load %arg1[%c0, %c0_0] : memref<16x784xbf16, #tpu.memory_space<vmem>>, vector<16x784xbf16>
    %c0_1 = arith.constant 0 : index
    %c0_2 = arith.constant 0 : index
    %1 = vector.load %arg2[%c0_1, %c0_2] : memref<784x128xbf16, #tpu.memory_space<vmem>>, vector<784x128xbf16>
    %cst = arith.constant dense<0.000000e+00> : vector<16x128xf32>
    %2 = tpu.matmul %0, %1, %cst {dimension_numbers = #tpu.dot_dimension_numbers<[1], [0], [0], [1], [0, 0, 1, 1], [], []>} : vector<16x784xbf16>, vector<784x128xbf16>, vector<16x128xf32> -> vector<16x128xf32>
    %c0_3 = arith.constant 0 : index
    %c0_4 = arith.constant 0 : index
    %3 = vector.load %arg3[%c0_3, %c0_4] : memref<1x128xf32, #tpu.memory_space<vmem>>, vector<1x128xf32>
    %4 = vector.broadcast %3 : vector<1x128xf32> to vector<16x128xf32>
    %5 = arith.addf %2, %4 : vector<16x128xf32>
    %cst_5 = arith.constant 0.000000e+00 : f32
    %6 = vector.broadcast %cst_5 : f32 to vector<16x128xf32>
    %7 = arith.maximumf %5, %6 : vector<16x128xf32>
    %8 = arith.truncf %7 : vector<16x128xf32> to vector<16x128xbf16>
    %c0_6 = arith.constant 0 : index
    %c0_7 = arith.constant 0 : index
    %9 = vector.load %arg4[%c0_6, %c0_7] : memref<128x256xbf16, #tpu.memory_space<vmem>>, vector<128x256xbf16>
    %cst_8 = arith.constant dense<0.000000e+00> : vector<16x256xf32>
    %10 = tpu.matmul %8, %9, %cst_8 {dimension_numbers = #tpu.dot_dimension_numbers<[1], [0], [0], [1], [0, 0, 1, 1], [], []>} : vector<16x128xbf16>, vector<128x256xbf16>, vector<16x256xf32> -> vector<16x256xf32>
    %c0_9 = arith.constant 0 : index
    %c0_10 = arith.constant 0 : index
    %11 = vector.load %arg5[%c0_9, %c0_10] : memref<1x256xf32, #tpu.memory_space<vmem>>, vector<1x256xf32>
    %12 = vector.broadcast %11 : vector<1x256xf32> to vector<16x256xf32>
    %13 = arith.addf %10, %12 : vector<16x256xf32>
    %cst_11 = arith.constant 0.000000e+00 : f32
    %14 = vector.broadcast %cst_11 : f32 to vector<16x256xf32>
    %15 = arith.maximumf %13, %14 : vector<16x256xf32>
    %16 = arith.truncf %15 : vector<16x256xf32> to vector<16x256xbf16>
    %c0_12 = arith.constant 0 : index
    %c0_13 = arith.constant 0 : index
    %17 = vector.load %arg6[%c0_12, %c0_13] : memref<256x128xbf16, #tpu.memory_space<vmem>>, vector<256x128xbf16>
    %cst_14 = arith.constant dense<0.000000e+00> : vector<16x128xf32>
    %18 = tpu.matmul %16, %17, %cst_14 {dimension_numbers = #tpu.dot_dimension_numbers<[1], [0], [0], [1], [0, 0, 1, 1], [], []>} : vector<16x256xbf16>, vector<256x128xbf16>, vector<16x128xf32> -> vector<16x128xf32>
    %c0_15 = arith.constant 0 : index
    %c0_16 = arith.constant 0 : index
    %19 = vector.load %arg7[%c0_15, %c0_16] : memref<1x128xf32, #tpu.memory_space<vmem>>, vector<1x128xf32>
    %20 = vector.broadcast %19 : vector<1x128xf32> to vector<16x128xf32>
    %21 = arith.addf %18, %20 : vector<16x128xf32>
    %22 = arith.truncf %21 : vector<16x128xf32> to vector<16x128xbf16>
    %c0_17 = arith.constant 0 : index
    %c0_18 = arith.constant 0 : index
    %23 = vector.load %arg8[%c0_17, %c0_18] : memref<16x128xbf16, #tpu.memory_space<vmem>>, vector<16x128xbf16>
    tpu.vector_store %arg8[%c0_17, %c0_18], %22 {strides = array<i32>} : memref<16x128xbf16, #tpu.memory_space<vmem>>, vector<16x128xbf16>,
    return
  }
  func.func @transform_0(%arg0: i32) -> (i32, i32) {
    %c0_i32 = arith.constant 0 : i32
    %c0_i32_0 = arith.constant 0 : i32
    return %arg0, %c0_i32 : i32, i32
  }
  func.func @transform_1(%arg0: i32) -> (i32, i32) {
    %c0_i32 = arith.constant 0 : i32
    %c0_i32_0 = arith.constant 0 : i32
    %c0_i32_1 = arith.constant 0 : i32
    return %c0_i32, %c0_i32_0 : i32, i32
  }
  func.func @transform_2(%arg0: i32) -> (i32, i32) {
    %c0_i32 = arith.constant 0 : i32
    %c0_i32_0 = arith.constant 0 : i32
    %c0_i32_1 = arith.constant 0 : i32
    return %c0_i32, %c0_i32_0 : i32, i32
  }
  func.func @transform_3(%arg0: i32) -> (i32, i32) {
    %c0_i32 = arith.constant 0 : i32
    %c0_i32_0 = arith.constant 0 : i32
    %c0_i32_1 = arith.constant 0 : i32
    return %c0_i32, %c0_i32_0 : i32, i32
  }
  func.func @transform_4(%arg0: i32) -> (i32, i32) {
    %c0_i32 = arith.constant 0 : i32
    %c0_i32_0 = arith.constant 0 : i32
    %c0_i32_1 = arith.constant 0 : i32
    return %c0_i32, %c0_i32_0 : i32, i32
  }
  func.func @transform_5(%arg0: i32) -> (i32, i32) {
    %c0_i32 = arith.constant 0 : i32
    %c0_i32_0 = arith.constant 0 : i32
    %c0_i32_1 = arith.constant 0 : i32
    return %c0_i32, %c0_i32_0 : i32, i32
  }
  func.func @transform_6(%arg0: i32) -> (i32, i32) {
    %c0_i32 = arith.constant 0 : i32
    %c0_i32_0 = arith.constant 0 : i32
    %c0_i32_1 = arith.constant 0 : i32
    return %c0_i32, %c0_i32_0 : i32, i32
  }
  func.func @transform_7(%arg0: i32) -> (i32, i32) {
    %c0_i32 = arith.constant 0 : i32
    %c0_i32_0 = arith.constant 0 : i32
    return %arg0, %c0_i32 : i32, i32
  }
}

</mosaic_0001>

<bundles_post_ra>
// kernel: simple_nn_forward.1
= control target key start
LH: loop header
LB: loop body
LE: loop exit
PB: predicated region body
PF: predicated region fallthrough
CT: control target
= control target key end

     0   :  { %12 = vsyncpa [#allocation3], 0  ;;  %s1519_s0 = inlined_call_operand.vmem [shape: bf16[16,784], index: 0, kind: input, shape index: {}]   ;;  %s1520_s1 = inlined_call_operand.hbm [shape: bf16[784,128], index: 1, kind: input, shape index: {}]   ;;  %s1521_s2 = inlined_call_operand.vmem [shape: f32[1,128], index: 2, kind: input, shape index: {}]   ;;  %s1522_s3 = inlined_call_operand.vmem [shape: bf16[128,256], index: 3, kind: input, shape index: {}]   ;;  %s1523_s4 = inlined_call_operand.vmem [shape: f32[1,256], index: 4, kind: input, shape index: {}]   ;;  %s1524_s5 = inlined_call_operand.hbm [shape: bf16[256,128], index: 5, kind: input, shape index: {}]   ;;  %s1525_s6 = inlined_call_operand.vmem [shape: f32[1,128], index: 6, kind: input, shape index: {}]   ;;  %s1526_s7 = inlined_call_operand.vmem [shape: bf16[16,128], index: 7, kind: output, shape index: {}]  }
   0x1   :  { %13 = vsyncpa [#allocation5], 0  ;;  %s1367_s24 = smov [#allocation2]   ;;  %s1319_s28 = scalar_lea.hbm %s1520_s1, 6272 }
   0x2   :  { %s21_s25 = sshll.u32 %s1367_s24, 4  ;;  %p1320_p0 = scmp.ne.s32.totalorder %s1520_s1, %s1319_s28  ;;  %s22_s25 = int_to_ptr.vmem [resolvable:$true] %s21_s25 }
   0x3   :  { %p1323_p1 = scmp.lt.u32.totalorder %s1319_s28, %s1520_s1 }
   0x5   :  { %p1325_p2 = pnand %p1323_p1, %p1320_p0 }
   0x7   :  { %1328 = shalt.err (!%p1325_p2)
}
   0x8   :  { %s1329_s10 = scalar_lea.vmem %s22_s25, 6272  ;;  %p1334_p4 = scmp.lt.s32.totalorder %s22_s25, %s22_s25 }
   0x9   :  { %p1330_p3 = scmp.ne.s32.totalorder %s22_s25, %s1329_s10  ;;  %p1335_p5 = scmp.lt.s32.totalorder %s1329_s10, %s1329_s10 }
   0xb   :  { %p1336_p6 = por %p1335_p5, %p1334_p4 }
   0xd   :  { %p1337_p7 = pnand %p1336_p6, %p1330_p3 }
   0xf   :  { %1340 = shalt.err (!%p1337_p7)
}
  0x10   :  { %s1368_s11 = smov 64   ;;  %s1369_s12 = smov 4  }
  0x11   :  { %27 = dma.hbm_to_vmem [thread:$0]  %s1520_s1, 6272, %s22_s25, [#allocation3], %s1368_s11, %s1368_s11, %s1369_s12  }
  0x12   :  { %s1370_s15 = smov [#allocation4]   ;;  %s1341_s19 = scalar_lea.hbm %s1524_s5, 2048 }
  0x13   :  { %s39_s16 = sshll.u32 %s1370_s15, 4  ;;  %p1342_p8 = scmp.ne.s32.totalorder %s1524_s5, %s1341_s19  ;;  %s40_s16 = int_to_ptr.vmem [resolvable:$true] %s39_s16 }
  0x14   :  { %p1345_p9 = scmp.lt.u32.totalorder %s1341_s19, %s1524_s5 }
  0x16   :  { %p1347_p10 = pnand %p1345_p9, %p1342_p8 }
  0x18   :  { %1350 = shalt.err (!%p1347_p10)
}
  0x19   :  { %s1351_s24 = scalar_lea.vmem %s40_s16, 2048  ;;  %p1356_p12 = scmp.lt.s32.totalorder %s40_s16, %s40_s16 }
  0x1a   :  { %p1352_p11 = scmp.ne.s32.totalorder %s40_s16, %s1351_s24  ;;  %p1357_p13 = scmp.lt.s32.totalorder %s1351_s24, %s1351_s24 }
  0x1c   :  { %p1358_p0 = por %p1357_p13, %p1356_p12 }
  0x1e   :  { %p1359_p1 = pnand %p1358_p0, %p1352_p11 }
  0x20   :  { %1362 = shalt.err (!%p1359_p1)
}
  0x21   :  { %45 = dma.hbm_to_vmem [thread:$0]  %s1524_s5, 2048, %s40_s16, [#allocation5], %s1368_s11, %s1368_s11, %s1369_s12  }
  0x22   :  { %1363 = dma.done.wait [#allocation3], 6272  }
  0x23   :  { %1364 = vsyncadd [#allocation3], 4294961024 }
  0x24   :  { %1365 = dma.done.wait [#allocation5], 2048  }
  0x25   :  { %1366 = vsyncadd [#allocation5], 4294965248  ;;  %v1220_v0 = vld [vmem:[#allocation2 + $0x40] sm:$0xff]   ;;  %v1224_v4 = vld [vmem:[#allocation2 + $0x48] sm:$0xff]   ;;  %v1371_v38 = vmov 0.0   ;;  %vm1372_vm0 = vmmov 0  }
  0x26   :  { %v1221_v1 = vld [vmem:[#allocation2] sm:$0xff]   ;;  %1117 = vmatprep.subr.bf16.mxu0 %v1220_v0  ;;  %v1225_v5 = vld [vmem:[#allocation2 + $0x8] sm:$0xff]   ;;  %v1228_v8 = vld [vmem:[#allocation2 + $0x50] sm:$0xff]   ;;  %vm497_vm1 = vcmask 130048  }
  0x27   :  { %v1222_v2 = vld [vmem:[#allocation2 + $0xc0] sm:$0xff]   ;;  %1118 = vmatpush3.bf16.msra.mxu0 %v1221_v1  ;;  %v1226_v6 = vld [vmem:[#allocation2 + $0xc8] sm:$0xff]   ;;  %v1229_v9 = vld [vmem:[#allocation2 + $0x10] sm:$0xff]  }
  0x28   :  { %v1223_v3 = vld [vmem:[#allocation2 + $0x80] sm:$0xff]   ;;  %1139 = vmatprep.subr.bf16.mxu1 %v1222_v2  ;;  %1119 = vmatprep.subr.bf16.mxu0 %v1224_v4  ;;  %v1227_v7 = vld [vmem:[#allocation2 + $0x88] sm:$0xff]   ;;  %v1230_v10 = vld [vmem:[#allocation2 + $0xd0] sm:$0xff]  }
  0x29   :  { %1140 = vmatpush3.bf16.msra.mxu1 %v1223_v3  ;;  %v1231_v11 = vld [vmem:[#allocation2 + $0x90] sm:$0xff]   ;;  %v1232_v12 = vld [vmem:[#allocation2 + $0x58] sm:$0xff]   ;;  %v1236_v16 = vld [vmem:[#allocation2 + $0x60] sm:$0xff]  }
  0x2a   :  { %1141 = vmatprep.subr.bf16.mxu1 %v1226_v6  ;;  %v1233_v13 = vld [vmem:[#allocation2 + $0x18] sm:$0xff]   ;;  %v1237_v17 = vld [vmem:[#allocation2 + $0x20] sm:$0xff]   ;;  %v1240_v20 = vld [vmem:[#allocation2 + $0x68] sm:$0xff]  }
  0x2b   :  { %1120 = vmatpush3.bf16.msra.mxu0 %v1225_v5  ;;  %v1234_v14 = vld [vmem:[#allocation2 + $0xd8] sm:$0xff]   ;;  %v1238_v18 = vld [vmem:[#allocation2 + $0xe0] sm:$0xff]   ;;  %v1241_v21 = vld [vmem:[#allocation2 + $0x28] sm:$0xff]  }
  0x2c   :  { %1121 = vmatprep.subr.bf16.mxu0 %v1228_v8  ;;  %v1235_v15 = vld [vmem:[#allocation2 + $0x98] sm:$0xff]   ;;  %v1239_v19 = vld [vmem:[#allocation2 + $0xa0] sm:$0xff]   ;;  %v1242_v22 = vld [vmem:[#allocation2 + $0xe8] sm:$0xff]  }
  0x2d   :  { %1142 = vmatpush3.bf16.msra.mxu1 %v1227_v7  ;;  %v1243_v23 = vld [vmem:[#allocation2 + $0xa8] sm:$0xff]   ;;  %v1244_v24 = vld [vmem:[#allocation2 + $0x70] sm:$0xff]   ;;  %v1248_v28 = vld [vmem:[#allocation2 + $0x78] sm:$0xff]  }
  0x2e   :  { %1143 = vmatprep.subr.bf16.mxu1 %v1230_v10  ;;  %v1245_v25 = vld [vmem:[#allocation2 + $0x30] sm:$0xff]   ;;  %v1249_v29 = vld [vmem:[#allocation2 + $0x38] sm:$0xff]   ;;  %v1253_v32 = vld [vmem:[%s1519_s0 + $0x4] ss:$28 sps:$4 sm:$0xff]  }
  0x2f   :  { %1122 = vmatpush3.bf16.msra.mxu0 %v1229_v9  ;;  %v1246_v26 = vld [vmem:[#allocation2 + $0xf0] sm:$0xff]   ;;  %v1250_v30 = vld [vmem:[#allocation2 + $0xf8] sm:$0xff]   ;;  %533 = vmatprep.mubr.bf16.mxu0 %v1253_v32  ;;  %v1255_v34 = vld [vmem:[#allocation2 + $0x140] sm:$0xff]   ;;  %v1373_v9 = vmov 0  }
  0x30   :  { %1123 = vmatprep.subr.bf16.mxu0 %v1232_v12  ;;  %v1247_v27 = vld [vmem:[#allocation2 + $0xb0] sm:$0xff]   ;;  %v1251_v31 = vld [vmem:[%s1519_s0] ss:$28 sps:$4 sm:$0xff]   ;;  %v1256_v35 = vld [vmem:[%s1519_s0 + $0x8] ss:$28 sps:$4 sm:$0xff]  }
  0x31   :  { %1144 = vmatpush3.bf16.msra.mxu1 %v1231_v11  ;;  %v1254_v33 = vld [vmem:[#allocation2 + $0xb8] sm:$0xff]   ;;  %v1258_v36 = vld [vmem:[%s1519_s0 + $0xc] ss:$28 sps:$4 sm:$0xff]   ;;  %v1259_v37 = vld [vmem:[#allocation2 + $0x100] sm:$0xff]  }
  0x32   :  { %1145 = vmatprep.subr.bf16.mxu1 %v1234_v14  ;;  %574 = vmatprep.mubr.bf16.mxu1 %v1258_v36  ;;  %v1260_v39 = vld [vmem:[#allocation2 + $0x148] sm:$0xff]   ;;  %v1262_v41 = vld [vmem:[#allocation2 + $0x150] sm:$0xff]   ;;  %v1264_v43 = vld [vmem:[#allocation2 + $0x158] sm:$0xff]  }
  0x33   :  { %1124 = vmatpush3.bf16.msra.mxu0 %v1233_v13  ;;  %v1261_v40 = vld [vmem:[#allocation2 + $0x108] sm:$0xff]   ;;  %v1263_v42 = vld [vmem:[#allocation2 + $0x110] sm:$0xff]   ;;  %v1265_v44 = vld [vmem:[#allocation2 + $0x118] sm:$0xff]  }
  0x34   :  { %1125 = vmatprep.subr.bf16.mxu0 %v1236_v16  ;;  %v1266_v45 = vld [vmem:[#allocation2 + $0x160] sm:$0xff]   ;;  %v1268_v47 = vld [vmem:[#allocation2 + $0x168] sm:$0xff]   ;;  %v1277_v50 = vld [vmem:[%s1519_s0 + $0x14] ss:$28 sps:$4 sm:$0xff]  }
  0x35   :  { %1146 = vmatpush3.bf16.msra.mxu1 %v1235_v15  ;;  %v1267_v46 = vld [vmem:[#allocation2 + $0x120] sm:$0xff]   ;;  %v1269_v49 = vld [vmem:[#allocation2 + $0x128] sm:$0xff]   ;;  %v1270_v51 = vld [vmem:[#allocation2 + $0x170] sm:$0xff]  }
  0x36   :  { %1147 = vmatprep.subr.bf16.mxu1 %v1238_v18  ;;  %v1274_v48 = vld [vmem:[#allocation2 + $0x180] sm:$0xff]   ;;  %v1278_v52 = vld [vmem:[%s1519_s0 + $0x18] ss:$28 sps:$4 sm:$0xff]   ;;  %v1275_v56 = vld [vmem:[%s1519_s0 + $0x10] ss:$28 sps:$4 sm:$0xff]  }
  0x37   :  { %1126 = vmatpush3.bf16.msra.mxu0 %v1237_v17  ;;  %v1271_v53 = vld [vmem:[#allocation2 + $0x130] sm:$0xff]   ;;  %v1272_v54 = vld [vmem:[#allocation2 + $0x178] sm:$0xff]   ;;  %v1279_v57 = vld [vmem:[%s1522_s3] ss:$8 sps:$4 sm:$0xff]  }
  0x38   :  { %1127 = vmatprep.subr.bf16.mxu0 %v1240_v20  ;;  %v1273_v55 = vld [vmem:[#allocation2 + $0x138] sm:$0xff]   ;;  %v1281_v58 = vld [vmem:[%s1522_s3 + $0x4] ss:$8 sps:$4 sm:$0xff]   ;;  %v1285_v62 = vld [vmem:[%s1522_s3 + $0x20] ss:$8 sps:$4 sm:$0xff]  }
  0x39   :  { %1148 = vmatpush3.bf16.msra.mxu1 %v1239_v19  ;;  %v1284_v59 = vld [vmem:[%s1522_s3 + $0x14] ss:$8 sps:$4 sm:$0xff]   ;;  %v1282_v60 = vld [vmem:[%s1522_s3 + $0x10] ss:$8 sps:$4 sm:$0xff]   ;;  %v1287_v61 = vld [vmem:[%s1522_s3 + $0x24] ss:$8 sps:$4 sm:$0xff]  }
  0x3a   :  { %1149 = vmatprep.subr.bf16.mxu1 %v1242_v22  ;;  %v1290_v63 = vld [vmem:[%s1522_s3 + $0x34] ss:$8 sps:$4 sm:$0xff]   ;;  %v1288_v0 = vld [vmem:[%s1522_s3 + $0x30] ss:$8 sps:$4 sm:$0xff]   ;;  %v1293_v1 = vld [vmem:[%s1522_s3 + $0x44] ss:$8 sps:$4 sm:$0xff]  }
  0x3b   :  { %1128 = vmatpush3.bf16.msra.mxu0 %v1241_v21  ;;  %v1291_v2 = vld [vmem:[%s1522_s3 + $0x40] ss:$8 sps:$4 sm:$0xff]   ;;  %v1296_v3 = vld [vmem:[%s1522_s3 + $0x54] ss:$8 sps:$4 sm:$0xff]   ;;  %v1294_v4 = vld [vmem:[%s1522_s3 + $0x50] ss:$8 sps:$4 sm:$0xff]  }
  0x3c   :  { %1129 = vmatprep.subr.bf16.mxu0 %v1244_v24  ;;  %v1299_v5 = vld [vmem:[%s1522_s3 + $0x64] ss:$8 sps:$4 sm:$0xff]   ;;  %v1297_v6 = vld [vmem:[%s1522_s3 + $0x60] ss:$8 sps:$4 sm:$0xff]   ;;  %v1302_v7 = vld [vmem:[%s1522_s3 + $0x74] ss:$8 sps:$4 sm:$0xff]  }
  0x3d   :  { %1150 = vmatpush3.bf16.msra.mxu1 %v1243_v23  ;;  %v1300_v8 = vld [vmem:[%s1522_s3 + $0x70] ss:$8 sps:$4 sm:$0xff]   ;;  %v1303_v10 = vld [vmem:[#allocation4 + $0x40] sm:$0xff]   ;;  %v1309_v16 = vld [vmem:[#allocation4 + $0x58] sm:$0xff]  }
  0x3e   :  { %1151 = vmatprep.subr.bf16.mxu1 %v1246_v26  ;;  %v1304_v11 = vld [vmem:[#allocation4] sm:$0xff]   ;;  %v1305_v12 = vld [vmem:[#allocation4 + $0x48] sm:$0xff]   ;;  %v1307_v14 = vld [vmem:[#allocation4 + $0x50] sm:$0xff]  }
  0x3f   :  { %1130 = vmatpush3.bf16.msra.mxu0 %v1245_v25  ;;  %v1306_v13 = vld [vmem:[#allocation4 + $0x8] sm:$0xff]   ;;  %v1308_v15 = vld [vmem:[#allocation4 + $0x10] sm:$0xff]   ;;  %v1310_v17 = vld [vmem:[#allocation4 + $0x18] sm:$0xff]  }
  0x40   :  { %1131 = vmatprep.subr.bf16.mxu0 %v1248_v28  ;;  %v1311_v18 = vld [vmem:[#allocation4 + $0x60] sm:$0xff]   ;;  %v1313_v20 = vld [vmem:[#allocation4 + $0x68] sm:$0xff]   ;;  %v1017_v22 = vld [vmem:[%s1521_s2] ss:$0 sm:$0xff] }
  0x41   :  { %1152 = vmatpush3.bf16.msra.mxu1 %v1247_v27  ;;  %v1312_v19 = vld [vmem:[#allocation4 + $0x20] sm:$0xff]  }
  0x42   :  { %1153 = vmatprep.subr.bf16.mxu1 %v1250_v30 }
  0x43   :  { %1132 = vmatpush3.bf16.msra.mxu0 %v1249_v29 }
  0x44   :  { %1161 = vmatprep.subr.bf16.mxu0 %v1255_v34 }
  0x45   :  { %1154 = vmatpush3.bf16.msra.mxu1 %v1254_v33 }
  0x46   :  { %534 = vmatmul.mubr.bf16.vlgmr.msra.gmra.mrb[0].mxu0 %v1251_v31  ;;  %1207 = vmatprep.subr.bf16.mxu1 %v1371_v38 }
  0x47   :  { %1162 = vmatpush3.bf16.msra.mxu0 %v1259_v37  ;;  %615 = vmatprep.mubr.bf16.mxu0 %v1277_v50 }
  0x48   :  { %575 = vmatmul.mubr.bf16.vlgmr.msra.gmra.mrb[0].mxu1 %v1256_v35  ;;  %1163 = vmatprep.subr.bf16.mxu0 %v1260_v39 }
  0x49   :  { %1209 = vmatprep.mubr.msk.bf16.mxu1 %vm1372_vm0, %v1371_v38  ;;  %1208 = vmatpush3.bf16.msra.mxu1 %v1274_v48 }
  0x4a   :  { %776 = vmatprep.subr.bf16.mxu1 %v1281_v58  ;;  %v1317_v58 = vld [vmem:[#allocation4 + $0x78] sm:$0xff]  }
  0x4b   :  { %1164 = vmatpush3.bf16.msra.mxu0 %v1261_v40 }
  0x4c   :  { %1165 = vmatprep.subr.bf16.mxu0 %v1262_v41 }
  0x4f   :  { %1166 = vmatpush3.bf16.msra.mxu0 %v1263_v42 }
  0x50   :  { %1167 = vmatprep.subr.bf16.mxu0 %v1264_v43  ;;  %1210 = vmatmul.mubr.msk.bf16.vlgmr.msra.gmra.mrb[4].mxu1 %vm497_vm1, %v1278_v52 }
  0x51   :  { %777 = vmatpush1.bf16.msra.mxu1 %v1279_v57  ;;  %808 = vmatprep.mubr.bf16.mxu1 %v1373_v9  ;;  %v1316_v57 = vld [vmem:[#allocation4 + $0x30] sm:$0xff]  }
  0x52   :  { %778 = vmatprep.subr.bf16.mxu1 %v1284_v59  ;;  %v1318_v59 = vld [vmem:[#allocation4 + $0x38] sm:$0xff]  }
  0x53   :  { %1168 = vmatpush3.bf16.msra.mxu0 %v1265_v44 }
  0x54   :  { %1169 = vmatprep.subr.bf16.mxu0 %v1266_v45 }
  0x55   :  { %779 = vmatpush1.bf16.msra.mxu1 %v1282_v60  ;;  %v686_v60 = vlaneseq }
  0x56   :  { %780 = vmatprep.subr.bf16.mxu1 %v1287_v61 }
  0x57   :  { %1170 = vmatpush3.bf16.msra.mxu0 %v1267_v46  ;;  %v687_v61 = vshrl.u32 %v686_v60, 7 }
  0x58   :  { %1171 = vmatprep.subr.bf16.mxu0 %v1268_v47 }
  0x59   :  { %781 = vmatpush1.bf16.msra.mxu1 %v1285_v62  ;;  %v688_v62 = vsub.s32 0, %v687_v61 }
  0x5a   :  { %782 = vmatprep.subr.bf16.mxu1 %v1290_v63  ;;  %v684_v63 = vld [vmem:[%s1523_s4] sm:$0x3] }
  0x5b   :  { %1172 = vmatpush3.bf16.msra.mxu0 %v1269_v49 }
  0x5c   :  { %1173 = vmatprep.subr.bf16.mxu0 %v1270_v51 }
  0x5d   :  { %783 = vmatpush1.bf16.msra.mxu1 %v1288_v0  ;;  %v692_v0 = vsub.s32 1, %v687_v61 }
  0x5e   :  { %784 = vmatprep.subr.bf16.mxu1 %v1293_v1  ;;  %v689_v1 = vrot.slane %v684_v63, %v688_v62 }
  0x5f   :  { %1174 = vmatpush3.bf16.msra.mxu0 %v1271_v53 }
  0x60   :  { %1175 = vmatprep.subr.bf16.mxu0 %v1272_v54 }
  0x61   :  { %785 = vmatpush1.bf16.msra.mxu1 %v1291_v2  ;;  %v693_v2 = vrot.slane %v684_v63, %v692_v0 }
  0x62   :  { %786 = vmatprep.subr.bf16.mxu1 %v1296_v3 }
  0x63   :  { %1176 = vmatpush3.bf16.msra.mxu0 %v1273_v55  ;;  %v1314_v55 = vld [vmem:[#allocation4 + $0x28] sm:$0xff]  }
  0x64   :  { %1185 = vmatprep.subr.bf16.mxu0 %v1303_v10 }
  0x65   :  { %787 = vmatpush1.bf16.msra.mxu1 %v1294_v4 }
  0x66   :  { %616 = vmatmul.mubr.bf16.vlgmr.msra.gmra.mrb[4].mxu0 %v1275_v56  ;;  %788 = vmatprep.subr.bf16.mxu1 %v1299_v5  ;;  %v1315_v56 = vld [vmem:[#allocation4 + $0x70] sm:$0xff]  }
  0x67   :  { %1186 = vmatpush3.bf16.msra.mxu0 %v1304_v11 }
  0x68   :  { %1187 = vmatprep.subr.bf16.mxu0 %v1305_v12 }
  0x69   :  { %789 = vmatpush1.bf16.msra.mxu1 %v1297_v6 }
  0x6a   :  { %790 = vmatprep.subr.bf16.mxu1 %v1302_v7 }
  0x6b   :  { %1188 = vmatpush3.bf16.msra.mxu0 %v1306_v13 }
  0x6c   :  { %1189 = vmatprep.subr.bf16.mxu0 %v1307_v14 }
  0x6d   :  { %791 = vmatpush1.bf16.msra.mxu1 %v1300_v8 }
  0x6f   :  { %1190 = vmatpush3.bf16.msra.mxu0 %v1308_v15 }
  0x70   :  { %1191 = vmatprep.subr.bf16.mxu0 %v1309_v16 }
  0x73   :  { %1192 = vmatpush3.bf16.msra.mxu0 %v1310_v17 }
  0x74   :  { %1193 = vmatprep.subr.bf16.mxu0 %v1311_v18 }
  0x77   :  { %1194 = vmatpush3.bf16.msra.mxu0 %v1312_v19 }
  0x78   :  { %1195 = vmatprep.subr.bf16.mxu0 %v1313_v20 }
  0x7b   :  { %1196 = vmatpush3.bf16.msra.mxu0 %v1314_v55 }
  0x7c   :  { %1197 = vmatprep.subr.bf16.mxu0 %v1315_v56 }
  0x7f   :  { %1198 = vmatpush3.bf16.msra.mxu0 %v1316_v57 }
  0x80   :  { %1199 = vmatprep.subr.bf16.mxu0 %v1317_v58 }
  0x83   :  { %1200 = vmatpush3.bf16.msra.mxu0 %v1318_v59 }
 0x119   :  { %v1133_v21 = vpop.f32.mrb[0].mxu0 }
 0x11a   :  { %v1134_v23 = vpop.f32.mrb[1].mxu0 }
 0x11b   :  { %v1135_v24 = vadd.f32 %v1134_v23, %v1133_v21  ;;  %v1136_v25 = vpop.f32.mrb[2].mxu0  ;;  %v1155_v26 = vpop.f32.mrb[0].mxu1  ;;  %v1091_v21 = vld [vmem:[%s1525_s6] ss:$0 sm:$0xff] }
 0x11c   :  { %v1137_v27 = vpop.f32.mrb[3].mxu0  ;;  %v1156_v30 = vpop.f32.mrb[1].mxu1 }
 0x11d   :  { %v536_v28 = vadd.f32 %v1135_v24, %v1017_v22  ;;  %v1138_v29 = vadd.f32 %v1137_v27, %v1136_v25  ;;  %v1157_v31 = vadd.f32 %v1156_v30, %v1155_v26  ;;  %v1158_v32 = vpop.f32.mrb[2].mxu1 }
 0x11e   :  { %v1159_v34 = vpop.f32.mrb[3].mxu1 }
 0x11f   :  { %v539_v33 = vadd.f32 %v1138_v29, %v1017_v22  ;;  %v577_v35 = vadd.f32 %v1157_v31, %v536_v28  ;;  %v1160_v36 = vadd.f32 %v1159_v34, %v1158_v32 }
 0x121   :  { %v580_v37 = vadd.f32 %v1160_v36, %v539_v33 }
 0x123   :  { %v658_v38 = vpop.f32.mrb[4].mxu1 }
 0x124   :  { %v1211_v39 = vpop.f32.mrb[5].mxu1 }
 0x125   :  { %v661_v40 = vpop.f32.mrb[6].mxu1 }
 0x126   :  { %v1212_v41 = vpop.f32.mrb[7].mxu1 }
 0x139   :  { %v1177_v42 = vpop.f32.mrb[4].mxu0 }
 0x13a   :  { %v1178_v43 = vpop.f32.mrb[5].mxu0 }
 0x13b   :  { %v1179_v44 = vadd.f32 %v1178_v43, %v1177_v42  ;;  %v1180_v45 = vpop.f32.mrb[6].mxu0 }
 0x13c   :  { %v1181_v46 = vpop.f32.mrb[7].mxu0 }
 0x13d   :  { %v618_v47 = vadd.f32 %v1179_v44, %v577_v35  ;;  %v1182_v48 = vadd.f32 %v1181_v46, %v1180_v45 }
 0x13f   :  { %v659_v49 = vadd.f32 %v658_v38, %v618_v47  ;;  %v621_v50 = vadd.f32 %v1182_v48, %v580_v37 }
 0x141   :  { %v662_v51 = vadd.f32 %v661_v40, %v621_v50  ;;  %v665_v52 = vmax.f32 %v659_v49, 0.0 }
 0x143   :  { %v666_v53 = vmax.f32 %v662_v51, 0.0 }
 0x145   :  { %v667_v54 = vpack.c.bf16 %v666_v53, %v665_v52 }
 0x147   :  { %809 = vmatmul.mubr.bf16.vlgmr.msra.gmra.mrb[8].mxu1 %v667_v54 }
 0x21a   :  { %v810_v3 = vpop.f32.mrb[8].mxu1 }
 0x21b   :  { %v811_v4 = vadd.f32 %v810_v3, %v689_v1  ;;  %v812_v5 = vpop.f32.mrb[9].mxu1 }
 0x21c   :  { %v813_v6 = vadd.f32 %v812_v5, %v693_v2  ;;  %v814_v7 = vpop.f32.mrb[10].mxu1 }
 0x21d   :  { %v815_v8 = vadd.f32 %v814_v7, %v689_v1  ;;  %v816_v9 = vpop.f32.mrb[11].mxu1  ;;  %v819_v11 = vmax.f32 %v811_v4, 0.0 }
 0x21e   :  { %v817_v10 = vadd.f32 %v816_v9, %v693_v2  ;;  %v820_v13 = vmax.f32 %v813_v6, 0.0 }
 0x21f   :  { %v821_v12 = vmax.f32 %v815_v8, 0.0 }
 0x220   :  { %v822_v14 = vmax.f32 %v817_v10, 0.0 }
 0x221   :  { %v823_v15 = vpack.c.bf16 %v821_v12, %v819_v11 }
 0x222   :  { %v824_v16 = vpack.c.bf16 %v822_v14, %v820_v13 }
 0x224   :  { %992 = vmatprep.mubr.bf16.mxu0 %v824_v16 }
 0x225   :  { %993 = vmatmul.mubr.bf16.vlgmr.msra.gmra.mrb[8].mxu0 %v823_v15 }
 0x2f8   :  { %v1201_v17 = vpop.f32.mrb[8].mxu0 }
 0x2f9   :  { %v1202_v18 = vpop.f32.mrb[9].mxu0 }
 0x2fa   :  { %v1203_v19 = vadd.f32 %v1202_v18, %v1201_v17  ;;  %v1204_v20 = vpop.f32.mrb[10].mxu0 }
 0x2fb   :  { %v1205_v22 = vpop.f32.mrb[11].mxu0 }
 0x2fc   :  { %v1206_v23 = vadd.f32 %v1205_v22, %v1204_v20  ;;  %v995_v24 = vadd.f32 %v1203_v19, %v1091_v21 }
 0x2fe   :  { %v998_v25 = vadd.f32 %v1206_v23, %v1091_v21 }
 0x300   :  { %v1115_v26 = vpack.c.bf16 %v998_v25, %v995_v24 }
 0x302   :  { %1116 = vst [vmem:[%s1526_s7] sm:$0xff] %v1115_v26  }
 0x303   :  { %1015 = vsyncpa [#allocation3], 1 }
 0x304   :  { %1016 = vsyncpa [#allocation5], 1 }

</bundles_post_ra>
